<compile_context>
chip_gen: v7x
topology: tpu7x:2x2x1
jax: 0.10.0
libtpu: 0.0.40
codegen_flags: <defaults>
</compile_context>

<pallas_src>
import functools

import jax
import jax.numpy as jnp
from jax.experimental import pallas as pl
from jax.experimental.pallas import tpu as pltpu

HIDDEN = 128          # hidden width of fc1/fc2 (fixed by the PyTorch module)
LANE = 128            # TPU lane width
MAX_TILE_B = 512      # batch tile (multiple of 8); fits easily in VMEM on v5e/v6e/v7x


def _round_up(n, m):
    return ((n + m - 1) // m) * m


def rainbow_dqn_kernel(x_ref, w1_ref, b1_ref, w2_ref, b2_ref, wh_ref, bh_ref,
                       q_ref, *, d_out):
    # fc1 + relu  (bf16 MXU inputs, f32 accumulation & elementwise)
    x = x_ref[...].astype(jnp.bfloat16)
    h1 = jnp.dot(x, w1_ref[...], preferred_element_type=jnp.float32) + b1_ref[...]
    h1 = jnp.maximum(h1, 0.0)

    # fc2 + relu
    h2 = jnp.dot(h1.astype(jnp.bfloat16), w2_ref[...],
                 preferred_element_type=jnp.float32) + b2_ref[...]
    h2 = jnp.maximum(h2, 0.0)

    # Fused dueling head: columns [0, d_out) = advantage, column d_out = value,
    # remaining padding columns have zero weight/bias.
    head = jnp.dot(h2.astype(jnp.bfloat16), wh_ref[...],
                   preferred_element_type=jnp.float32) + bh_ref[...]
    adv = head[:, :d_out]                       # [tile_b, d_out]
    value = head[:, d_out:d_out + 1]            # [tile_b, 1]
    adv_mean = jnp.mean(adv, axis=1, keepdims=True)

    # q[:, j] = value + (adv_j - mean(adv)) for j < d_out.  Writing the full
    # 128-lane-wide block keeps the store unmasked / lane-dense; the trailing
    # columns hold garbage and are sliced off in the wrapper.
    q_ref[...] = head + (value - adv_mean)


def rainbow_dqn_forward(x, params, d_out):
    """x: [B, d_in] float32.  params: dict from init_params.  Returns [B, d_out] f32."""
    B, d_in = x.shape
    head_pad = params["wh"].shape[1]

    # Batch tile: full batch if small, otherwise 512-row tiles (multiple of 8).
    tile_b = B if B <= MAX_TILE_B else MAX_TILE_B
    grid = (pl.cdiv(B, tile_b),)

    def resident(shape):  # weights/biases: same block every grid step -> VMEM-resident
        return pl.BlockSpec(shape, lambda i: (0, 0))

    q_padded = pl.pallas_call(
        functools.partial(rainbow_dqn_kernel, d_out=d_out),
        out_shape=jax.ShapeDtypeStruct((B, head_pad), jnp.float32),
        grid=grid,
        in_specs=[
            pl.BlockSpec((tile_b, d_in), lambda i: (i, 0)),   # x: tiled over batch
            resident((d_in, HIDDEN)),                         # w1 (bf16)
            resident((1, HIDDEN)),                            # b1 (f32)
            resident((HIDDEN, HIDDEN)),                       # w2 (bf16)
            resident((1, HIDDEN)),                            # b2 (f32)
            resident((HIDDEN, head_pad)),                     # fused head weight (bf16)
            resident((1, head_pad)),                          # fused head bias (f32)
        ],
        out_specs=pl.BlockSpec((tile_b, head_pad), lambda i: (i, 0)),
        compiler_params=pltpu.CompilerParams(
            dimension_semantics=("parallel",),                # megacore on v7x
            vmem_limit_bytes=32 << 20,                        # safe on v7x's 64 MiB VMEM
        ),
    )(
        x,
        params["w1"], params["b1"],
        params["w2"], params["b2"],
        params["wh"], params["bh"],
    )
    return q_padded[:, :d_out]


def init_params(key, input_dim, output_dim):
    """nn.Linear-style init (uniform +/- 1/sqrt(fan_in)).

    Weights are pre-transposed to [fan_in, fan_out] and stored in bf16 (MXU
    input dtype); biases stay f32.  The value & advantage heads are fused into
    one weight wh = [adv | value | zero-pad] of lane-aligned width."""
    ks = jax.random.split(key, 8)

    def linear(kw, kb, fan_in, fan_out):
        bound = 1.0 / jnp.sqrt(jnp.float32(fan_in))
        w = jax.random.uniform(kw, (fan_in, fan_out), jnp.float32, -bound, bound)
        b = jax.random.uniform(kb, (1, fan_out), jnp.float32, -bound, bound)
        return w, b

    w1, b1 = linear(ks[0], ks[1], input_dim, HIDDEN)
    w2, b2 = linear(ks[2], ks[3], HIDDEN, HIDDEN)
    wv, bv = linear(ks[4], ks[5], HIDDEN, 1)
    wa, ba = linear(ks[6], ks[7], HIDDEN, output_dim)

    head_pad = _round_up(output_dim + 1, LANE)
    pad_cols = head_pad - output_dim - 1
    wh = jnp.concatenate([wa, wv, jnp.zeros((HIDDEN, pad_cols), jnp.float32)], axis=1)
    bh = jnp.concatenate([ba, bv, jnp.zeros((1, pad_cols), jnp.float32)], axis=1)

    return {
        "w1": w1.astype(jnp.bfloat16), "b1": b1,
        "w2": w2.astype(jnp.bfloat16), "b2": b2,
        "wh": wh.astype(jnp.bfloat16), "bh": bh,
    }


def reference_forward(x, p, d_out):
    """Pure-JAX reference mirroring the kernel's bf16-in / f32-accumulate math."""
    h1 = jnp.maximum(
        jnp.dot(x.astype(jnp.bfloat16), p["w1"],
                preferred_element_type=jnp.float32) + p["b1"], 0.0)
    h2 = jnp.maximum(
        jnp.dot(h1.astype(jnp.bfloat16), p["w2"],
                preferred_element_type=jnp.float32) + p["b2"], 0.0)
    head = jnp.dot(h2.astype(jnp.bfloat16), p["wh"],
                   preferred_element_type=jnp.float32) + p["bh"]
    adv = head[:, :d_out]
    value = head[:, d_out:d_out + 1]
    return value + (adv - adv.mean(axis=1, keepdims=True))


if __name__ == "__main__":
    key = jax.random.PRNGKey(0)
    k_param, k_x = jax.random.split(key)

    batch = 8
    input_dim = 32
    output_dim = 16

    params = init_params(k_param, input_dim, output_dim)
    x = jax.random.normal(k_x, (batch, input_dim), jnp.float32)

    q = rainbow_dqn_forward(x, params, output_dim)
    q = jax.block_until_ready(q)

    q_ref = reference_forward(x, params, output_dim)
    assert q.shape == (batch, output_dim)
    assert jnp.allclose(q, q_ref, atol=2e-2, rtol=2e-2), "mismatch vs reference"

    print("KERNEL_OK")
</pallas_src>

<mosaic_0001>
module attributes {stable_mosaic.version = 11 : i64} {
  func.func @rainbow_dqn_kernel(%arg0: i32, %arg1: memref<8x32xf32, #tpu.memory_space<vmem>>, %arg2: memref<32x128xbf16, #tpu.memory_space<vmem>>, %arg3: memref<1x128xf32, #tpu.memory_space<vmem>>, %arg4: memref<128x128xbf16, #tpu.memory_space<vmem>>, %arg5: memref<1x128xf32, #tpu.memory_space<vmem>>, %arg6: memref<128x128xbf16, #tpu.memory_space<vmem>>, %arg7: memref<1x128xf32, #tpu.memory_space<vmem>>, %arg8: memref<8x128xf32, #tpu.memory_space<vmem>>) attributes {dimension_semantics = [#tpu.dimension_semantics<parallel>], iteration_bounds = array<i64: 1>, scalar_prefetch = 0 : i64, scratch_operands = 0 : i64, tpu.core_type = #tpu.core_type<tc>, window_params = [{transform_indices = @transform_0, window_bounds = array<i64: 8, 32>}, {pipeline_mode = #tpu.pipeline_mode<synchronous>, transform_indices = @transform_1, window_bounds = array<i64: 32, 128>}, {pipeline_mode = #tpu.pipeline_mode<synchronous>, transform_indices = @transform_2, window_bounds = array<i64: 1, 128>}, {pipeline_mode = #tpu.pipeline_mode<synchronous>, transform_indices = @transform_3, window_bounds = array<i64: 128, 128>}, {pipeline_mode = #tpu.pipeline_mode<synchronous>, transform_indices = @transform_4, window_bounds = array<i64: 1, 128>}, {pipeline_mode = #tpu.pipeline_mode<synchronous>, transform_indices = @transform_5, window_bounds = array<i64: 128, 128>}, {pipeline_mode = #tpu.pipeline_mode<synchronous>, transform_indices = @transform_6, window_bounds = array<i64: 1, 128>}, {transform_indices = @transform_7, window_bounds = array<i64: 8, 128>}]} {
    %c0 = arith.constant 0 : index
    %c0_0 = arith.constant 0 : index
    %0 = vector.load %arg1[%c0, %c0_0] : memref<8x32xf32, #tpu.memory_space<vmem>>, vector<8x32xf32>
    %1 = arith.truncf %0 : vector<8x32xf32> to vector<8x32xbf16>
    %c0_1 = arith.constant 0 : index
    %c0_2 = arith.constant 0 : index
    %2 = vector.load %arg2[%c0_1, %c0_2] : memref<32x128xbf16, #tpu.memory_space<vmem>>, vector<32x128xbf16>
    %cst = arith.constant dense<0.000000e+00> : vector<8x128xf32>
    %3 = tpu.matmul %1, %2, %cst {dimension_numbers = #tpu.dot_dimension_numbers<[1], [0], [0], [1], [0, 0, 1, 1], [], []>} : vector<8x32xbf16>, vector<32x128xbf16>, vector<8x128xf32> -> vector<8x128xf32>
    %c0_3 = arith.constant 0 : index
    %c0_4 = arith.constant 0 : index
    %4 = vector.load %arg3[%c0_3, %c0_4] : memref<1x128xf32, #tpu.memory_space<vmem>>, vector<1x128xf32>
    %5 = vector.broadcast %4 : vector<1x128xf32> to vector<8x128xf32>
    %6 = arith.addf %3, %5 : vector<8x128xf32>
    %cst_5 = arith.constant 0.000000e+00 : f32
    %7 = vector.broadcast %cst_5 : f32 to vector<8x128xf32>
    %8 = arith.maximumf %6, %7 : vector<8x128xf32>
    %9 = arith.truncf %8 : vector<8x128xf32> to vector<8x128xbf16>
    %c0_6 = arith.constant 0 : index
    %c0_7 = arith.constant 0 : index
    %10 = vector.load %arg4[%c0_6, %c0_7] : memref<128x128xbf16, #tpu.memory_space<vmem>>, vector<128x128xbf16>
    %cst_8 = arith.constant dense<0.000000e+00> : vector<8x128xf32>
    %11 = tpu.matmul %9, %10, %cst_8 {dimension_numbers = #tpu.dot_dimension_numbers<[1], [0], [0], [1], [0, 0, 1, 1], [], []>} : vector<8x128xbf16>, vector<128x128xbf16>, vector<8x128xf32> -> vector<8x128xf32>
    %c0_9 = arith.constant 0 : index
    %c0_10 = arith.constant 0 : index
    %12 = vector.load %arg5[%c0_9, %c0_10] : memref<1x128xf32, #tpu.memory_space<vmem>>, vector<1x128xf32>
    %13 = vector.broadcast %12 : vector<1x128xf32> to vector<8x128xf32>
    %14 = arith.addf %11, %13 : vector<8x128xf32>
    %cst_11 = arith.constant 0.000000e+00 : f32
    %15 = vector.broadcast %cst_11 : f32 to vector<8x128xf32>
    %16 = arith.maximumf %14, %15 : vector<8x128xf32>
    %17 = arith.truncf %16 : vector<8x128xf32> to vector<8x128xbf16>
    %c0_12 = arith.constant 0 : index
    %c0_13 = arith.constant 0 : index
    %18 = vector.load %arg6[%c0_12, %c0_13] : memref<128x128xbf16, #tpu.memory_space<vmem>>, vector<128x128xbf16>
    %cst_14 = arith.constant dense<0.000000e+00> : vector<8x128xf32>
    %19 = tpu.matmul %17, %18, %cst_14 {dimension_numbers = #tpu.dot_dimension_numbers<[1], [0], [0], [1], [0, 0, 1, 1], [], []>} : vector<8x128xbf16>, vector<128x128xbf16>, vector<8x128xf32> -> vector<8x128xf32>
    %c0_15 = arith.constant 0 : index
    %c0_16 = arith.constant 0 : index
    %20 = vector.load %arg7[%c0_15, %c0_16] : memref<1x128xf32, #tpu.memory_space<vmem>>, vector<1x128xf32>
    %21 = vector.broadcast %20 : vector<1x128xf32> to vector<8x128xf32>
    %22 = arith.addf %19, %21 : vector<8x128xf32>
    %23 = vector.extract_strided_slice %22 {offsets = [0, 0], sizes = [8, 16], strides = [1, 1]} : vector<8x128xf32> to vector<8x16xf32>
    %24 = vector.extract_strided_slice %22 {offsets = [0, 16], sizes = [8, 1], strides = [1, 1]} : vector<8x128xf32> to vector<8x1xf32>
    %cst_17 = arith.constant dense<0.000000e+00> : vector<8xf32>
    %25 = vector.multi_reduction <add>, %23, %cst_17 [1] : vector<8x16xf32> to vector<8xf32>
    %26 = vector.shape_cast %25 : vector<8xf32> to vector<8x1xf32>
    %cst_18 = arith.constant 1.600000e+01 : f32
    %27 = vector.broadcast %cst_18 : f32 to vector<8x1xf32>
    %28 = arith.divf %26, %27 : vector<8x1xf32>
    %29 = arith.subf %24, %28 : vector<8x1xf32>
    %30 = vector.broadcast %29 : vector<8x1xf32> to vector<8x128xf32>
    %31 = arith.addf %22, %30 : vector<8x128xf32>
    %c0_19 = arith.constant 0 : index
    %c0_20 = arith.constant 0 : index
    %32 = vector.load %arg8[%c0_19, %c0_20] : memref<8x128xf32, #tpu.memory_space<vmem>>, vector<8x128xf32>
    tpu.vector_store %arg8[%c0_19, %c0_20], %31 {strides = array<i32>} : memref<8x128xf32, #tpu.memory_space<vmem>>, vector<8x128xf32>,
    return
  }
  func.func @transform_0(%arg0: i32) -> (i32, i32) {
    %c0_i32 = arith.constant 0 : i32
    %c0_i32_0 = arith.constant 0 : i32
    return %arg0, %c0_i32 : i32, i32
  }
  func.func @transform_1(%arg0: i32) -> (i32, i32) {
    %c0_i32 = arith.constant 0 : i32
    %c0_i32_0 = arith.constant 0 : i32
    %c0_i32_1 = arith.constant 0 : i32
    return %c0_i32, %c0_i32_0 : i32, i32
  }
  func.func @transform_2(%arg0: i32) -> (i32, i32) {
    %c0_i32 = arith.constant 0 : i32
    %c0_i32_0 = arith.constant 0 : i32
    %c0_i32_1 = arith.constant 0 : i32
    return %c0_i32, %c0_i32_0 : i32, i32
  }
  func.func @transform_3(%arg0: i32) -> (i32, i32) {
    %c0_i32 = arith.constant 0 : i32
    %c0_i32_0 = arith.constant 0 : i32
    %c0_i32_1 = arith.constant 0 : i32
    return %c0_i32, %c0_i32_0 : i32, i32
  }
  func.func @transform_4(%arg0: i32) -> (i32, i32) {
    %c0_i32 = arith.constant 0 : i32
    %c0_i32_0 = arith.constant 0 : i32
    %c0_i32_1 = arith.constant 0 : i32
    return %c0_i32, %c0_i32_0 : i32, i32
  }
  func.func @transform_5(%arg0: i32) -> (i32, i32) {
    %c0_i32 = arith.constant 0 : i32
    %c0_i32_0 = arith.constant 0 : i32
    %c0_i32_1 = arith.constant 0 : i32
    return %c0_i32, %c0_i32_0 : i32, i32
  }
  func.func @transform_6(%arg0: i32) -> (i32, i32) {
    %c0_i32 = arith.constant 0 : i32
    %c0_i32_0 = arith.constant 0 : i32
    %c0_i32_1 = arith.constant 0 : i32
    return %c0_i32, %c0_i32_0 : i32, i32
  }
  func.func @transform_7(%arg0: i32) -> (i32, i32) {
    %c0_i32 = arith.constant 0 : i32
    %c0_i32_0 = arith.constant 0 : i32
    return %arg0, %c0_i32 : i32, i32
  }
}

</mosaic_0001>

<bundles_post_ra>
// kernel: tpu_custom_call.1
= control target key start
LH: loop header
LB: loop body
LE: loop exit
PB: predicated region body
PF: predicated region fallthrough
CT: control target
= control target key end

     0   :  { %12 = vsyncpa [#allocation3], 0  ;;  %s797_s0 = inlined_call_operand.hbm [shape: f32[8,32], index: 0, kind: input, shape index: {}]   ;;  %s798_s1 = inlined_call_operand.hbm [shape: bf16[32,128], index: 1, kind: input, shape index: {}]   ;;  %s799_s2 = inlined_call_operand.vmem [shape: f32[1,128], index: 2, kind: input, shape index: {}]   ;;  %s800_s3 = inlined_call_operand.hbm [shape: bf16[128,128], index: 3, kind: input, shape index: {}]   ;;  %s801_s4 = inlined_call_operand.vmem [shape: f32[1,128], index: 4, kind: input, shape index: {}]   ;;  %s802_s5 = inlined_call_operand.hbm [shape: bf16[128,128], index: 5, kind: input, shape index: {}]   ;;  %s803_s6 = inlined_call_operand.vmem [shape: f32[1,128], index: 6, kind: input, shape index: {}]   ;;  %s804_s7 = inlined_call_operand.hbm [shape: f32[8,128], index: 7, kind: output, shape index: {}]  }
   0x1   :  { %13 = vsyncpa [#allocation6], 0 }
   0x2   :  { %14 = vsyncpa [#allocation9], 0 }
   0x3   :  { %15 = vsyncpa [#allocation4], 0  ;;  %s645_s24 = smov [#allocation5]   ;;  %s527_s28 = scalar_lea.hbm %s798_s1, 256 }
   0x4   :  { %s31_s25 = sshll.u32 %s645_s24, 4  ;;  %p528_p0 = scmp.ne.s32.totalorder %s798_s1, %s527_s28  ;;  %s32_s25 = int_to_ptr.vmem [resolvable:$true] %s31_s25 }
   0x5   :  { %p531_p1 = scmp.lt.u32.totalorder %s527_s28, %s798_s1 }
   0x7   :  { %p533_p2 = pnand %p531_p1, %p528_p0 }
   0x9   :  { %536 = shalt.err (!%p533_p2)
}
   0xa   :  { %s537_s10 = scalar_lea.vmem %s32_s25, 256  ;;  %p542_p4 = scmp.lt.s32.totalorder %s32_s25, %s32_s25 }
   0xb   :  { %p538_p3 = scmp.ne.s32.totalorder %s32_s25, %s537_s10  ;;  %p543_p5 = scmp.lt.s32.totalorder %s537_s10, %s537_s10 }
   0xd   :  { %p544_p6 = por %p543_p5, %p542_p4 }
   0xf   :  { %p545_p7 = pnand %p544_p6, %p538_p3 }
  0x11   :  { %548 = shalt.err (!%p545_p7)
}
  0x12   :  { %s646_s11 = smov 64   ;;  %s647_s12 = smov 4  }
  0x13   :  { %37 = dma.hbm_to_vmem [thread:$0]  %s798_s1, 256, %s32_s25, [#allocation6], %s646_s11, %s646_s11, %s647_s12  }
  0x14   :  { %s648_s15 = smov [#allocation2]   ;;  %s649_s17 = smov [#allocation7]  }
  0x15   :  { %s22_s16 = sshll.u32 %s648_s15, 4  ;;  %s45_s18 = sshll.u32 %s649_s17, 4  ;;  %s23_s16 = int_to_ptr.vmem [resolvable:$true] %s22_s16  ;;  %s46_s18 = int_to_ptr.vmem [resolvable:$true] %s45_s18 }
  0x16   :  { %s549_s21 = scalar_lea.hbm %s797_s0, 128 }
  0x17   :  { %p550_p8 = scmp.ne.s32.totalorder %s797_s0, %s549_s21  ;;  %p553_p9 = scmp.lt.u32.totalorder %s549_s21, %s797_s0 }
  0x19   :  { %p555_p10 = pnand %p553_p9, %p550_p8 }
  0x1b   :  { %558 = shalt.err (!%p555_p10)
}
  0x1c   :  { %s559_s1 = scalar_lea.vmem %s23_s16, 128  ;;  %p564_p12 = scmp.lt.s32.totalorder %s23_s16, %s23_s16 }
  0x1d   :  { %p560_p11 = scmp.ne.s32.totalorder %s23_s16, %s559_s1  ;;  %p565_p13 = scmp.lt.s32.totalorder %s559_s1, %s559_s1 }
  0x1f   :  { %p566_p0 = por %p565_p13, %p564_p12 }
  0x21   :  { %p567_p1 = pnand %p566_p0, %p560_p11 }
  0x23   :  { %570 = shalt.err (!%p567_p1)
}
  0x24   :  { %25 = dma.hbm_to_vmem [thread:$0]  %s797_s0, 128, %s23_s16, [#allocation3]  }
  0x25   :  { %s571_s30 = scalar_lea.hbm %s800_s3, 1024 }
  0x26   :  { %p572_p2 = scmp.ne.s32.totalorder %s800_s3, %s571_s30  ;;  %p575_p3 = scmp.lt.u32.totalorder %s571_s30, %s800_s3 }
  0x28   :  { %p577_p4 = pnand %p575_p3, %p572_p2 }
  0x2a   :  { %580 = shalt.err (!%p577_p4)
}
  0x2b   :  { %s581_s14 = scalar_lea.vmem %s46_s18, 1024  ;;  %p586_p6 = scmp.lt.s32.totalorder %s46_s18, %s46_s18 }
  0x2c   :  { %p582_p5 = scmp.ne.s32.totalorder %s46_s18, %s581_s14  ;;  %p587_p7 = scmp.lt.s32.totalorder %s581_s14, %s581_s14 }
  0x2e   :  { %p588_p8 = por %p587_p7, %p586_p6 }
  0x30   :  { %p589_p9 = pnand %p588_p8, %p582_p5 }
  0x32   :  { %592 = shalt.err (!%p589_p9)
}
  0x33   :  { %51 = dma.hbm_to_vmem [thread:$0]  %s800_s3, 1024, %s46_s18, [#allocation6], %s646_s11, %s646_s11, %s647_s12  }
  0x34   :  { %s650_s16 = smov [#allocation8]   ;;  %s593_s21 = scalar_lea.hbm %s802_s5, 1024 }
  0x35   :  { %s59_s17 = sshll.u32 %s650_s16, 4  ;;  %p594_p10 = scmp.ne.s32.totalorder %s802_s5, %s593_s21  ;;  %s60_s17 = int_to_ptr.vmem [resolvable:$true] %s59_s17 }
  0x36   :  { %p597_p11 = scmp.lt.u32.totalorder %s593_s21, %s802_s5 }
  0x38   :  { %p599_p12 = pnand %p597_p11, %p594_p10 }
  0x3a   :  { %602 = shalt.err (!%p599_p12)
}
  0x3b   :  { %s603_s1 = scalar_lea.vmem %s60_s17, 1024  ;;  %p608_p0 = scmp.lt.s32.totalorder %s60_s17, %s60_s17 }
  0x3c   :  { %p604_p13 = scmp.ne.s32.totalorder %s60_s17, %s603_s1  ;;  %p609_p1 = scmp.lt.s32.totalorder %s603_s1, %s603_s1 }
  0x3e   :  { %p610_p2 = por %p609_p1, %p608_p0 }
  0x40   :  { %p611_p3 = pnand %p610_p2, %p604_p13 }
  0x42   :  { %614 = shalt.err (!%p611_p3)
}
  0x43   :  { %65 = dma.hbm_to_vmem [thread:$0]  %s802_s5, 1024, %s60_s17, [#allocation9], %s646_s11, %s646_s11, %s647_s12  }
  0x44   :  { %637 = dma.done.wait [#allocation3], 128  }
  0x45   :  { %638 = vsyncadd [#allocation3], 4294967168 }
  0x46   :  { %639 = dma.done.wait [#allocation6], 1280  }
  0x47   :  { %640 = vsyncadd [#allocation6], 4294966016 }
  0x48   :  { %641 = dma.done.wait [#allocation9], 1024  }
  0x49   :  { %642 = vsyncadd [#allocation9], 4294966272  ;;  %v651_v0 = vmov 0.0   ;;  %vm652_vm0 = vmmov 0   ;;  %v509_v1 = vld [vmem:[#allocation5] sm:$0xff]   ;;  %v510_v2 = vld [vmem:[#allocation5 + $0x8] sm:$0xff]  }
  0x4a   :  { %450 = vmatprep.subr.bf16.mxu0 %v651_v0  ;;  %454 = vmatprep.mubr.msk.bf16.mxu0 %vm652_vm0, %v651_v0  ;;  %v81_v3 = vld [vmem:[#allocation2] sm:$0xff]  ;;  %v511_v4 = vld [vmem:[#allocation7] sm:$0xff]   ;;  %vm106_vm1 = vcmask 261120   ;;  %v513_v7 = vld [vmem:[#allocation7 + $0x10] sm:$0xff]   ;;  %vm376_vm2 = vcmask 130048   ;;  %v653_v44 = vmov 16  }
  0x4b   :  { %458 = vmatprep.subr.bf16.mxu1 %v651_v0  ;;  %474 = vmatprep.mubr.msk.bf16.mxu1 %vm652_vm0, %v651_v0  ;;  %v82_v5 = vpack.c.bf16 %v81_v3, %v81_v3  ;;  %v512_v6 = vld [vmem:[#allocation7 + $0x8] sm:$0xff]   ;;  %v514_v8 = vld [vmem:[#allocation7 + $0x18] sm:$0xff]   ;;  %v515_v9 = vld [vmem:[#allocation7 + $0x20] sm:$0xff]  }
  0x4c   :  { %451 = vmatpush3.bf16.msra.mxu0 %v509_v1  ;;  %459 = vmatpush3.bf16.msra.mxu1 %v511_v4  ;;  %v516_v10 = vld [vmem:[#allocation7 + $0x28] sm:$0xff]   ;;  %v517_v11 = vld [vmem:[#allocation7 + $0x30] sm:$0xff]   ;;  %v518_v12 = vld [vmem:[#allocation7 + $0x38] sm:$0xff]  }
  0x4d   :  { %452 = vmatprep.subr.bf16.mxu0 %v651_v0  ;;  %460 = vmatprep.subr.bf16.mxu1 %v651_v0  ;;  %v519_v13 = vld [vmem:[#allocation8] sm:$0xff]   ;;  %v520_v14 = vld [vmem:[#allocation8 + $0x8] sm:$0xff]   ;;  %v521_v15 = vld [vmem:[#allocation8 + $0x10] sm:$0xff]  }
  0x4e   :  { %v522_v16 = vld [vmem:[#allocation8 + $0x18] sm:$0xff]   ;;  %v523_v17 = vld [vmem:[#allocation8 + $0x20] sm:$0xff]   ;;  %v524_v18 = vld [vmem:[#allocation8 + $0x28] sm:$0xff]   ;;  %508 = vset.pattern.permute.xlu0 %v653_v44 }
  0x4f   :  { %v407_v19 = vld [vmem:[%s799_s2] ss:$0 sm:$0xff]  ;;  %v525_v27 = vld [vmem:[#allocation8 + $0x30] sm:$0xff]   ;;  %v526_v28 = vld [vmem:[#allocation8 + $0x38] sm:$0xff]  }
  0x50   :  { %453 = vmatpush3.bf16.msra.mxu0 %v510_v2  ;;  %461 = vmatpush3.bf16.msra.mxu1 %v512_v6  ;;  %v411_v29 = vld [vmem:[%s801_s4] ss:$0 sm:$0xff]  ;;  %s654_s4 = smov [#allocation10]  }
  0x51   :  { %478 = vmatprep.subr.bf16.mxu0 %v651_v0  ;;  %462 = vmatprep.subr.bf16.mxu1 %v651_v0  ;;  %v420_v37 = vld [vmem:[%s803_s6] ss:$0 sm:$0xff]  ;;  %s396_s28 = sshll.u32 %s654_s4, 4  ;;  %s397_s28 = int_to_ptr.vmem [resolvable:$true] %s396_s28 }
  0x52   :  { %s615_s6 = scalar_lea.vmem %s397_s28, 128  ;;  %p620_p5 = scmp.lt.s32.totalorder %s397_s28, %s397_s28 }
  0x53   :  { %455 = vmatmul.mubr.msk.bf16.vlgmr.msra.gmra.mrb[0].mxu0 %vm106_vm1, %v82_v5  ;;  %p616_p4 = scmp.ne.s32.totalorder %s397_s28, %s615_s6  ;;  %p621_p6 = scmp.lt.s32.totalorder %s615_s6, %s615_s6 }
  0x54   :  { %494 = vmatprep.mubr.msk.bf16.mxu0 %vm652_vm0, %v651_v0  ;;  %463 = vmatpush3.bf16.msra.mxu1 %v513_v7 }
  0x55   :  { %464 = vmatprep.subr.bf16.mxu1 %v651_v0  ;;  %479 = vmatpush3.bf16.msra.mxu0 %v519_v13  ;;  %p622_p7 = por %p621_p6, %p620_p5 }
  0x56   :  { %480 = vmatprep.subr.bf16.mxu0 %v651_v0 }
  0x57   :  { %p623_p8 = pnand %p622_p7, %p616_p4 }
  0x58   :  { %465 = vmatpush3.bf16.msra.mxu1 %v514_v8 }
  0x59   :  { %466 = vmatprep.subr.bf16.mxu1 %v651_v0  ;;  %481 = vmatpush3.bf16.msra.mxu0 %v520_v14 }
  0x5a   :  { %482 = vmatprep.subr.bf16.mxu0 %v651_v0 }
  0x5c   :  { %467 = vmatpush3.bf16.msra.mxu1 %v515_v9 }
  0x5d   :  { %468 = vmatprep.subr.bf16.mxu1 %v651_v0  ;;  %483 = vmatpush3.bf16.msra.mxu0 %v521_v15 }
  0x5e   :  { %484 = vmatprep.subr.bf16.mxu0 %v651_v0 }
  0x60   :  { %469 = vmatpush3.bf16.msra.mxu1 %v516_v10 }
  0x61   :  { %470 = vmatprep.subr.bf16.mxu1 %v651_v0  ;;  %485 = vmatpush3.bf16.msra.mxu0 %v522_v16 }
  0x62   :  { %486 = vmatprep.subr.bf16.mxu0 %v651_v0 }
  0x64   :  { %471 = vmatpush3.bf16.msra.mxu1 %v517_v11 }
  0x65   :  { %472 = vmatprep.subr.bf16.mxu1 %v651_v0  ;;  %487 = vmatpush3.bf16.msra.mxu0 %v523_v17 }
  0x66   :  { %488 = vmatprep.subr.bf16.mxu0 %v651_v0 }
  0x68   :  { %473 = vmatpush3.bf16.msra.mxu1 %v518_v12 }
  0x69   :  { %489 = vmatpush3.bf16.msra.mxu0 %v524_v18 }
  0x6a   :  { %490 = vmatprep.subr.bf16.mxu0 %v651_v0 }
  0x6d   :  { %491 = vmatpush3.bf16.msra.mxu0 %v525_v27 }
  0x6e   :  { %492 = vmatprep.subr.bf16.mxu0 %v651_v0 }
  0x71   :  { %493 = vmatpush3.bf16.msra.mxu0 %v526_v28 }
 0x126   :  { %v144_v20 = vpop.f32.mrb[0].mxu0 }
 0x127   :  { %v145_v21 = vadd.f32 %v407_v19, %v144_v20  ;;  %v456_v22 = vpop.f32.mrb[1].mxu0 }
 0x128   :  { %v147_v23 = vpop.f32.mrb[2].mxu0 }
 0x129   :  { %v150_v24 = vmax.f32 %v145_v21, 0.0  ;;  %v457_v25 = vpop.f32.mrb[3].mxu0 }
 0x12b   :  { %v151_v26 = vpack.c.bf16 %v150_v24, %v150_v24 }
 0x12d   :  { %475 = vmatmul.mubr.bf16.vlgmr.msra.gmra.mrb[0].mxu1 %v151_v26 }
 0x200   :  { %v257_v30 = vpop.f32.mrb[0].mxu1 }
 0x201   :  { %v258_v31 = vadd.f32 %v411_v29, %v257_v30  ;;  %v476_v32 = vpop.f32.mrb[1].mxu1 }
 0x202   :  { %v260_v33 = vpop.f32.mrb[2].mxu1 }
 0x203   :  { %v263_v34 = vmax.f32 %v258_v31, 0.0  ;;  %v477_v35 = vpop.f32.mrb[3].mxu1 }
 0x205   :  { %v264_v36 = vpack.c.bf16 %v263_v34, %v263_v34 }
 0x207   :  { %495 = vmatmul.mubr.bf16.vlgmr.msra.gmra.mrb[4].mxu0 %v264_v36 }
 0x2da   :  { %v370_v38 = vpop.f32.mrb[4].mxu0 }
 0x2db   :  { %v371_v39 = vadd.f32 %v420_v37, %v370_v38  ;;  %v496_v40 = vpop.f32.mrb[5].mxu0 }
 0x2dc   :  { %v373_v41 = vpop.f32.mrb[6].mxu0 }
 0x2dd   :  { %v497_v42 = vpop.f32.mrb[7].mxu0  ;;  %v377_v43 = vsel %vm376_vm2, %v371_v39, 0.0 }
 0x2de   :  { %378 = vadd.xlane.f32.xlu0 %v377_v43 }
 0x36b   :  { %v379_v45 = vpop.xlane.xlu0 %378 }
 0x36c   :  { %v381_v46 = vmul.f32 0.0625, %v379_v45 }
 0x36e   :  { %v382_v47 = vsub.f32 %v371_v39, %v381_v46 }
 0x370   :  { %385 = vperm.xlu0 %508, %v382_v47  }
 0x3ef   :  { %v386_v48 = vpop.permute.xlu0 %385 }
 0x3f0   :  { %v388_v49 = vadd.f32 %v386_v48, %v371_v39 }
 0x3f2   :  { %389 = vst [vmem:[#allocation10] sm:$0xff] %v388_v49 }
 0x3f3   :  { %626 = shalt.err (!%p623_p8)
}
 0x3f4   :  { %s627_s8 = scalar_lea.hbm %s804_s7, 128 }
 0x3f5   :  { %p628_p9 = scmp.ne.s32.totalorder %s804_s7, %s627_s8  ;;  %p631_p10 = scmp.lt.u32.totalorder %s627_s8, %s804_s7 }
 0x3f7   :  { %p633_p11 = pnand %p631_p10, %p628_p9 }
 0x3f9   :  { %636 = shalt.err (!%p633_p11)
}
 0x3fa   :  { %399 = dma.vmem_to_hbm [thread:$0]  %s397_s28, 128, %s804_s7, [#allocation4]  }
 0x3fb   :  { %643 = dma.done.wait [#allocation4], 128  }
 0x3fc   :  { %644 = vsyncadd [#allocation4], 4294967168 }
 0x3fd   :  { %403 = vsyncpa [#allocation3], 1 }
 0x3fe   :  { %404 = vsyncpa [#allocation6], 1 }
 0x3ff   :  { %405 = vsyncpa [#allocation9], 1 }
 0x400   :  { %406 = vsyncpa [#allocation4], 1 }

</bundles_post_ra>
